<compile_context>
chip_gen: v7x
topology: tpu7x:2x2x1
jax: 0.10.0
libtpu: 0.0.40
codegen_flags: <defaults>
</compile_context>

<pallas_src>
import jax
import jax.numpy as jnp
from jax.experimental import pallas as pl
from jax.experimental.pallas import tpu as pltpu


def _round_up(x: int, m: int) -> int:
    return ((x + m - 1) // m) * m


def _tile_defaults():
    """Pick tile ceilings + VMEM limit per TPU generation (conservative fallback)."""
    try:
        vmem = int(pltpu.get_tpu_info().vmem_capacity_bytes)
    except Exception:
        vmem = 64 << 20
    if vmem >= (100 << 20):
        # v5e / v6e: 128 MiB physical VMEM -> go big (≈1024 flops/byte intensity).
        return 1024, 1024, 512, min(96 << 20, (vmem * 3) // 4)
    # v7x: 64 MiB per TC -> 512x512 output tiles (~4 MiB double-buffered working set),
    # keeps the M/N grid >= 2 wide for megacore on realistic shapes.
    return 512, 512, 512, 48 << 20


def _linear_kernel(x_ref, w_ref, b_ref, o_ref):
    """One (i, j, k) grid step of y = x @ W^T + b.

    x_ref: (tm, tk) bf16
    w_ref: (tn, tk) bf16  -- native nn.Linear layout, contracted on the last dim
    b_ref: (1,  tn) f32   -- K-invariant bias tile
    o_ref: (tm, tn) f32   -- resident across the K axis, used as the accumulator
    """
    k = pl.program_id(2)

    @pl.when(k == 0)
    def _init():
        o_ref[...] = jnp.zeros_like(o_ref)

    o_ref[...] += jax.lax.dot_general(
        x_ref[...],
        w_ref[...],
        dimension_numbers=(((1,), (1,)), ((), ())),
        preferred_element_type=jnp.float32,
    )

    @pl.when(k == pl.num_programs(2) - 1)
    def _finalize():
        o_ref[...] += b_ref[...]


def vanilla_linear(x, w, b, *, tm=None, tn=None, tk=None):
    """Computes x @ w.T + b (same semantics as torch.nn.Linear).

    x: (B, in_dim) f32
    w: (h, in_dim) f32   (PyTorch Linear weight layout, NOT transposed here)
    b: (h,)        f32
    returns: (B, h) f32
    """
    B, K = x.shape
    N, K2 = w.shape
    assert K == K2 and b.shape == (N,)

    tm_d, tn_d, tk_d, vmem_limit = _tile_defaults()
    tm = tm_d if tm is None else tm
    tn = tn_d if tn is None else tn
    tk = tk_d if tk is None else tk

    # Clamp tiles to the (padded) problem: 16-row alignment for bf16 sublane packing,
    # 128-lane alignment for N and K.
    tm = min(tm, _round_up(B, 16))
    tn = min(tn, _round_up(N, 128))
    tk = min(tk, _round_up(K, 128))

    Mp = _round_up(B, tm)
    Kp = _round_up(K, tk)
    Np = _round_up(N, tn)

    # bf16 MXU operands (f32 accumulation in-kernel). Cast + pad form one short producer
    # chain per array (fused by XLA); padding is skipped entirely when already aligned.
    # NOTE: no transpose of W — it stays in its native (h, in_dim) layout.
    xb = x.astype(jnp.bfloat16)
    if (Mp, Kp) != (B, K):
        xb = jnp.pad(xb, ((0, Mp - B), (0, Kp - K)))
    wb = w.astype(jnp.bfloat16)
    if (Np, Kp) != (N, K):
        wb = jnp.pad(wb, ((0, Np - N), (0, Kp - K)))
    b2 = b.astype(jnp.float32).reshape(1, N)
    if Np != N:
        b2 = jnp.pad(b2, ((0, 0), (0, Np - N)))

    grid = (Mp // tm, Np // tn, Kp // tk)

    out_padded = pl.pallas_call(
        _linear_kernel,
        out_shape=jax.ShapeDtypeStruct((Mp, Np), jnp.float32),
        grid_spec=pltpu.PrefetchScalarGridSpec(
            num_scalar_prefetch=0,
            grid=grid,
            in_specs=[
                pl.BlockSpec((tm, tk), lambda i, j, k: (i, k)),  # x tile
                pl.BlockSpec((tn, tk), lambda i, j, k: (j, k)),  # W tile (native layout)
                pl.BlockSpec((1, tn), lambda i, j, k: (0, j)),   # bias tile (K-invariant)
            ],
            out_specs=pl.BlockSpec((tm, tn), lambda i, j, k: (i, j)),
        ),
        compiler_params=pltpu.CompilerParams(
            dimension_semantics=("parallel", "parallel", "arbitrary"),
            vmem_limit_bytes=vmem_limit,
        ),
    )(xb, wb, b2)

    return out_padded[:B, :N]


def _reference(x, w, b):
    # Same bf16 operand rounding the MXU sees, with f32 accumulation.
    xr = x.astype(jnp.bfloat16).astype(jnp.float32)
    wr = w.astype(jnp.bfloat16).astype(jnp.float32)
    return xr @ wr.T + b[None, :]


if __name__ == "__main__":
    key = jax.random.PRNGKey(0)
    k1, k2, k3, k4, k5, k6 = jax.random.split(key, 6)

    # ---- Toy shape matching the module: nn.Linear(in_dim=32, h=16), batch=8 ----
    B, in_dim, h = 8, 32, 16
    bound = 1.0 / (in_dim ** 0.5)
    w = jax.random.uniform(k1, (h, in_dim), jnp.float32, -bound, bound)
    b = jax.random.uniform(k2, (h,), jnp.float32, -bound, bound)
    x = jax.random.normal(k3, (B, in_dim), jnp.float32)

    out = jax.block_until_ready(vanilla_linear(x, w, b))
    ref = _reference(x, w, b)
    assert out.shape == (B, h)
    assert jnp.allclose(out, ref, atol=1e-3, rtol=1e-3)

    # ---- Larger shape exercising a 2x2x2 (M, N, K) grid with K accumulation ----
    B2, in2, h2 = 640, 768, 640
    bound2 = 1.0 / (in2 ** 0.5)
    w2 = jax.random.uniform(k4, (h2, in2), jnp.float32, -bound2, bound2)
    b2 = jax.random.uniform(k5, (h2,), jnp.float32, -bound2, bound2)
    x2 = jax.random.normal(k6, (B2, in2), jnp.float32)

    out2 = jax.block_until_ready(vanilla_linear(x2, w2, b2, tm=512, tn=512, tk=512))
    ref2 = _reference(x2, w2, b2)
    assert out2.shape == (B2, h2)
    assert jnp.allclose(out2, ref2, atol=2e-3, rtol=2e-3)

    print("KERNEL_OK")
</pallas_src>

<mosaic_0001>
module attributes {stable_mosaic.version = 11 : i64} {
  func.func @_linear_kernel(%arg0: i32, %arg1: i32, %arg2: i32, %arg3: memref<16x128xbf16, #tpu.memory_space<vmem>>, %arg4: memref<128x128xbf16, #tpu.memory_space<vmem>>, %arg5: memref<1x128xf32, #tpu.memory_space<vmem>>, %arg6: memref<16x128xf32, #tpu.memory_space<vmem>>) attributes {dimension_semantics = [#tpu.dimension_semantics<parallel>, #tpu.dimension_semantics<parallel>, #tpu.dimension_semantics<arbitrary>], iteration_bounds = array<i64: 1, 1, 1>, scalar_prefetch = 0 : i64, scratch_operands = 0 : i64, tpu.core_type = #tpu.core_type<tc>, window_params = [{transform_indices = @transform_0, window_bounds = array<i64: 16, 128>}, {transform_indices = @transform_1, window_bounds = array<i64: 128, 128>}, {transform_indices = @transform_2, window_bounds = array<i64: 1, 128>}, {transform_indices = @transform_3, window_bounds = array<i64: 16, 128>}]} {
    %c0_i32 = arith.constant 0 : i32
    %0 = arith.cmpi eq, %arg2, %c0_i32 : i32
    %1 = arith.extui %0 : i1 to i32
    %c0_i32_0 = arith.constant 0 : i32
    %2 = arith.cmpi ne, %1, %c0_i32_0 : i32
    scf.if %2 {
      %cst_10 = arith.constant 0.000000e+00 : f32
      %12 = vector.broadcast %cst_10 : f32 to vector<16x128xf32>
      %c0_11 = arith.constant 0 : index
      %c0_12 = arith.constant 0 : index
      %13 = vector.load %arg6[%c0_11, %c0_12] : memref<16x128xf32, #tpu.memory_space<vmem>>, vector<16x128xf32>
      tpu.vector_store %arg6[%c0_11, %c0_12], %12 {strides = array<i32>} : memref<16x128xf32, #tpu.memory_space<vmem>>, vector<16x128xf32>,
    } else {
    }
    %c0 = arith.constant 0 : index
    %c0_1 = arith.constant 0 : index
    %3 = vector.load %arg6[%c0, %c0_1] : memref<16x128xf32, #tpu.memory_space<vmem>>, vector<16x128xf32>
    %c0_2 = arith.constant 0 : index
    %c0_3 = arith.constant 0 : index
    %4 = vector.load %arg3[%c0_2, %c0_3] : memref<16x128xbf16, #tpu.memory_space<vmem>>, vector<16x128xbf16>
    %c0_4 = arith.constant 0 : index
    %c0_5 = arith.constant 0 : index
    %5 = vector.load %arg4[%c0_4, %c0_5] : memref<128x128xbf16, #tpu.memory_space<vmem>>, vector<128x128xbf16>
    %cst = arith.constant dense<0.000000e+00> : vector<16x128xf32>
    %6 = tpu.matmul %4, %5, %cst {dimension_numbers = #tpu.dot_dimension_numbers<[1], [1], [0], [0], [0, 0, 1, 0], [], []>} : vector<16x128xbf16>, vector<128x128xbf16>, vector<16x128xf32> -> vector<16x128xf32>
    %7 = arith.addf %3, %6 : vector<16x128xf32>
    %c0_6 = arith.constant 0 : index
    %c0_7 = arith.constant 0 : index
    %8 = vector.load %arg6[%c0_6, %c0_7] : memref<16x128xf32, #tpu.memory_space<vmem>>, vector<16x128xf32>
    tpu.vector_store %arg6[%c0_6, %c0_7], %7 {strides = array<i32>} : memref<16x128xf32, #tpu.memory_space<vmem>>, vector<16x128xf32>,
    %c0_i32_8 = arith.constant 0 : i32
    %9 = arith.cmpi eq, %arg2, %c0_i32_8 : i32
    %10 = arith.extui %9 : i1 to i32
    %c0_i32_9 = arith.constant 0 : i32
    %11 = arith.cmpi ne, %10, %c0_i32_9 : i32
    scf.if %11 {
      %c0_10 = arith.constant 0 : index
      %c0_11 = arith.constant 0 : index
      %12 = vector.load %arg6[%c0_10, %c0_11] : memref<16x128xf32, #tpu.memory_space<vmem>>, vector<16x128xf32>
      %c0_12 = arith.constant 0 : index
      %c0_13 = arith.constant 0 : index
      %13 = vector.load %arg5[%c0_12, %c0_13] : memref<1x128xf32, #tpu.memory_space<vmem>>, vector<1x128xf32>
      %14 = vector.broadcast %13 : vector<1x128xf32> to vector<16x128xf32>
      %15 = arith.addf %12, %14 : vector<16x128xf32>
      %c0_14 = arith.constant 0 : index
      %c0_15 = arith.constant 0 : index
      %16 = vector.load %arg6[%c0_14, %c0_15] : memref<16x128xf32, #tpu.memory_space<vmem>>, vector<16x128xf32>
      tpu.vector_store %arg6[%c0_14, %c0_15], %15 {strides = array<i32>} : memref<16x128xf32, #tpu.memory_space<vmem>>, vector<16x128xf32>,
    } else {
    }
    return
  }
  func.func @transform_0(%arg0: i32, %arg1: i32, %arg2: i32) -> (i32, i32) {
    %c0_i32 = arith.constant 0 : i32
    return %arg0, %arg2 : i32, i32
  }
  func.func @transform_1(%arg0: i32, %arg1: i32, %arg2: i32) -> (i32, i32) {
    %c0_i32 = arith.constant 0 : i32
    return %arg1, %arg2 : i32, i32
  }
  func.func @transform_2(%arg0: i32, %arg1: i32, %arg2: i32) -> (i32, i32) {
    %c0_i32 = arith.constant 0 : i32
    %c0_i32_0 = arith.constant 0 : i32
    return %c0_i32, %arg1 : i32, i32
  }
  func.func @transform_3(%arg0: i32, %arg1: i32, %arg2: i32) -> (i32, i32) {
    %c0_i32 = arith.constant 0 : i32
    return %arg0, %arg1 : i32, i32
  }
}

</mosaic_0001>

<bundles_post_ra>
// kernel: tpu_custom_call.1
= control target key start
LH: loop header
LB: loop body
LE: loop exit
PB: predicated region body
PF: predicated region fallthrough
CT: control target
= control target key end

     0   :  { %8 = vsyncpa [#allocation3], 0  ;;  %s400_s0 = inlined_call_operand.hbm [shape: bf16[16,128], index: 0, kind: input, shape index: {}]   ;;  %s401_s1 = inlined_call_operand.hbm [shape: bf16[128,128], index: 1, kind: input, shape index: {}]   ;;  %s402_s2 = inlined_call_operand.vmem [shape: f32[1,128], index: 2, kind: input, shape index: {}]   ;;  %s403_s3 = inlined_call_operand.hbm [shape: f32[16,128], index: 3, kind: output, shape index: {}]  }
   0x1   :  { %9 = vsyncpa [#allocation6], 0 }
   0x2   :  { %10 = vsyncpa [#allocation4], 0  ;;  %s332_s12 = smov [#allocation2]   ;;  %s260_s16 = scalar_lea.hbm %s400_s0, 128 }
   0x3   :  { %s16_s13 = sshll.u32 %s332_s12, 4  ;;  %p261_p0 = scmp.ne.s32.totalorder %s400_s0, %s260_s16  ;;  %s17_s13 = int_to_ptr.vmem [resolvable:$true] %s16_s13 }
   0x4   :  { %p264_p1 = scmp.lt.u32.totalorder %s260_s16, %s400_s0 }
   0x6   :  { %p266_p2 = pnand %p264_p1, %p261_p0 }
   0x8   :  { %269 = shalt.err (!%p266_p2)
}
   0x9   :  { %s270_s21 = scalar_lea.vmem %s17_s13, 128  ;;  %p275_p4 = scmp.lt.s32.totalorder %s17_s13, %s17_s13 }
   0xa   :  { %p271_p3 = scmp.ne.s32.totalorder %s17_s13, %s270_s21  ;;  %p276_p5 = scmp.lt.s32.totalorder %s270_s21, %s270_s21 }
   0xc   :  { %p277_p6 = por %p276_p5, %p275_p4 }
   0xe   :  { %p278_p7 = pnand %p277_p6, %p271_p3 }
  0x10   :  { %281 = shalt.err (!%p278_p7)
}
  0x11   :  { %s333_s22 = smov 64   ;;  %s334_s23 = smov 4  }
  0x12   :  { %22 = dma.hbm_to_vmem [thread:$0]  %s400_s0, 128, %s17_s13, [#allocation3], %s333_s22, %s333_s22, %s334_s23  }
  0x13   :  { %s335_s26 = smov [#allocation5]   ;;  %s282_s30 = scalar_lea.hbm %s401_s1, 1024 }
  0x14   :  { %s28_s27 = sshll.u32 %s335_s26, 4  ;;  %p283_p8 = scmp.ne.s32.totalorder %s401_s1, %s282_s30  ;;  %s29_s27 = int_to_ptr.vmem [resolvable:$true] %s28_s27 }
  0x15   :  { %p286_p9 = scmp.lt.u32.totalorder %s282_s30, %s401_s1 }
  0x17   :  { %p288_p10 = pnand %p286_p9, %p283_p8 }
  0x19   :  { %291 = shalt.err (!%p288_p10)
}
  0x1a   :  { %s292_s8 = scalar_lea.vmem %s29_s27, 1024  ;;  %p297_p12 = scmp.lt.s32.totalorder %s29_s27, %s29_s27 }
  0x1b   :  { %p293_p11 = scmp.ne.s32.totalorder %s29_s27, %s292_s8  ;;  %p298_p13 = scmp.lt.s32.totalorder %s292_s8, %s292_s8 }
  0x1d   :  { %p299_p0 = por %p298_p13, %p297_p12 }
  0x1f   :  { %p300_p1 = pnand %p299_p0, %p293_p11 }
  0x21   :  { %303 = shalt.err (!%p300_p1)
}
  0x22   :  { %34 = dma.hbm_to_vmem [thread:$0]  %s401_s1, 1024, %s29_s27, [#allocation6], %s333_s22, %s333_s22, %s334_s23  }
  0x23   :  { %326 = dma.done.wait [#allocation3], 128  }
  0x24   :  { %327 = vsyncadd [#allocation3], 4294967168 }
  0x25   :  { %328 = dma.done.wait [#allocation6], 1024  }
  0x26   :  { %329 = vsyncadd [#allocation6], 4294966272  ;;  %v336_v0 = vmov 0.0   ;;  %vm337_vm0 = vmmov 0   ;;  %v251_v1 = vld [vmem:[#allocation5] sm:$0xff]   ;;  %v252_v2 = vld [vmem:[#allocation5 + $0x8] sm:$0xff]  }
  0x27   :  { %222 = vmatprep.subr.bf16.mxu0 %v336_v0  ;;  %238 = vmatprep.mubr.msk.bf16.mxu0 %vm337_vm0, %v336_v0  ;;  %v253_v3 = vld [vmem:[#allocation5 + $0x10] sm:$0xff]   ;;  %v254_v4 = vld [vmem:[#allocation5 + $0x18] sm:$0xff]   ;;  %v255_v5 = vld [vmem:[#allocation5 + $0x20] sm:$0xff]   ;;  %s338_s11 = smov [#allocation7]  }
  0x28   :  { %223 = vmatpush3.bf16.xpose.msra.mxu0 %v251_v1  ;;  %v256_v6 = vld [vmem:[#allocation5 + $0x28] sm:$0xff]   ;;  %v257_v7 = vld [vmem:[#allocation5 + $0x30] sm:$0xff]   ;;  %v258_v8 = vld [vmem:[#allocation5 + $0x38] sm:$0xff]   ;;  %s190_s12 = sshll.u32 %s338_s11, 4  ;;  %s191_s12 = int_to_ptr.vmem [resolvable:$true] %s190_s12 }
  0x29   :  { %224 = vmatprep.subr.bf16.mxu0 %v336_v0  ;;  %v259_v9 = vld [vmem:[#allocation2] sm:$0xff]   ;;  %s304_s13 = scalar_lea.vmem %s191_s12, 256  ;;  %p309_p3 = scmp.lt.s32.totalorder %s191_s12, %s191_s12 }
  0x2a   :  { %v212_v11 = vld [vmem:[%s402_s2] ss:$0 sm:$0xff]  ;;  %p305_p2 = scmp.ne.s32.totalorder %s191_s12, %s304_s13  ;;  %p310_p4 = scmp.lt.s32.totalorder %s304_s13, %s304_s13 }
  0x2c   :  { %p311_p5 = por %p310_p4, %p309_p3 }
  0x2e   :  { %p312_p6 = pnand %p311_p5, %p305_p2 }
  0x30   :  { %225 = vmatpush3.bf16.xpose.msra.mxu0 %v252_v2 }
  0x31   :  { %226 = vmatprep.subr.bf16.mxu0 %v336_v0 }
  0x38   :  { %227 = vmatpush3.bf16.xpose.msra.mxu0 %v253_v3 }
  0x39   :  { %228 = vmatprep.subr.bf16.mxu0 %v336_v0 }
  0x40   :  { %229 = vmatpush3.bf16.xpose.msra.mxu0 %v254_v4 }
  0x41   :  { %230 = vmatprep.subr.bf16.mxu0 %v336_v0 }
  0x48   :  { %231 = vmatpush3.bf16.xpose.msra.mxu0 %v255_v5 }
  0x49   :  { %232 = vmatprep.subr.bf16.mxu0 %v336_v0 }
  0x50   :  { %233 = vmatpush3.bf16.xpose.msra.mxu0 %v256_v6 }
  0x51   :  { %234 = vmatprep.subr.bf16.mxu0 %v336_v0 }
  0x58   :  { %235 = vmatpush3.bf16.xpose.msra.mxu0 %v257_v7 }
  0x59   :  { %236 = vmatprep.subr.bf16.mxu0 %v336_v0 }
  0x60   :  { %237 = vmatpush3.bf16.xpose.msra.mxu0 %v258_v8 }
  0x67   :  { %239 = vmatmul.mubr.bf16.vlgmr.msra.gmra.mrb[0].mxu0 %v259_v9 }
 0x13a   :  { %v158_v10 = vpop.f32.mrb[0].mxu0 }
 0x13b   :  { %v240_v12 = vpop.f32.mrb[1].mxu0  ;;  %v181_v15 = vadd.f32 %v212_v11, %v158_v10 }
 0x13c   :  { %v161_v13 = vpop.f32.mrb[2].mxu0 }
 0x13d   :  { %v241_v14 = vpop.f32.mrb[3].mxu0  ;;  %v182_v16 = vadd.f32 %v212_v11, %v161_v13  ;;  %183 = vst [vmem:[#allocation7] sm:$0xff] %v181_v15 }
 0x13f   :  { %184 = vst [vmem:[#allocation7 + $0x8] sm:$0xff] %v182_v16 }
 0x140   :  { %315 = shalt.err (!%p312_p6)
}
 0x141   :  { %s316_s2 = scalar_lea.hbm %s403_s3, 256 }
 0x142   :  { %p317_p7 = scmp.ne.s32.totalorder %s403_s3, %s316_s2  ;;  %p320_p8 = scmp.lt.u32.totalorder %s316_s2, %s403_s3 }
 0x144   :  { %p322_p9 = pnand %p320_p8, %p317_p7 }
 0x146   :  { %325 = shalt.err (!%p322_p9)
}
 0x147   :  { %s339_s20 = smov 128   ;;  %s340_s21 = smov 8  }
 0x148   :  { %196 = dma.vmem_to_hbm [thread:$0]  %s191_s12, 256, %s403_s3, [#allocation4], %s339_s20, %s339_s20, %s340_s21  }
 0x149   :  { %330 = dma.done.wait [#allocation4], 256  }
 0x14a   :  { %331 = vsyncadd [#allocation4], 4294967040 }
 0x14b   :  { %200 = vsyncpa [#allocation3], 1 }
 0x14c   :  { %201 = vsyncpa [#allocation6], 1 }
 0x14d   :  { %202 = vsyncpa [#allocation4], 1 }

</bundles_post_ra>
